<compile_context>
chip_gen: v5e
topology: v5e:2x2
jax: 0.10.0
libtpu: 0.0.40
codegen_flags: <defaults>
</compile_context>

<pallas_src>
import jax
import jax.numpy as jnp
from jax.experimental import pallas as pl
from jax.experimental.pallas import tpu as pltpu

_LANE_CANDIDATES = (1024, 512, 256, 128)   # lane-dense last axis (mult. of 128)
_TARGET_BLOCK_BYTES = 4 << 20              # ~4 MiB per block
_VMEM_LIMIT_BYTES = 48 << 20               # fits v7x 64 MiB physical VMEM


def _cdiv(a, b):
    return (a + b - 1) // b


def _round_up(a, b):
    return _cdiv(a, b) * b


def _sq_scale_kernel(alpha_ref, x_ref, o_ref):
    # alpha_ref: SMEM (1,) scalar; x_ref/o_ref: (tm, lanes) VMEM tiles.
    a = alpha_ref[0]
    xv = x_ref[...]
    o_ref[...] = (xv * xv * a).astype(o_ref.dtype)


def mylayer_forward(x, alpha1):
    """y = alpha1 * x**2 as a tiled, lane-dense, pad-free Pallas TPU kernel.

    x: float array of any shape (NCHW in the module).
    alpha1: float array of shape (1,).
    """
    orig_shape = x.shape
    n = x.size

    if n == 0:
        return (x * x) * alpha1[0]

    # Pick a lane width that divides n exactly (no pad / no slice). Prefer a
    # width whose row count is also a multiple of 8 (clean sublane alignment).
    lanes = None
    for cand in _LANE_CANDIDATES:
        if n % cand == 0 and (n // cand) % 8 == 0:
            lanes = cand
            break
    if lanes is None:
        for cand in _LANE_CANDIDATES:
            if n % cand == 0:
                lanes = cand
                break
    if lanes is None:
        # Ragged size (not a multiple of 128): a single fused XLA elementwise
        # op is already at HBM roofline; avoid extra pad/slice HBM passes.
        return (x * x) * alpha1[0]

    rows = n // lanes
    x2d = x.reshape(rows, lanes)     # contiguous row-major -> free reshape

    itemsize = jnp.dtype(x.dtype).itemsize
    tm_cap = max(8, (_TARGET_BLOCK_BYTES // (lanes * itemsize)) // 8 * 8)

    if rows <= 8:
        # Single block equal to the full array dims (always a legal shape).
        tm = rows
    else:
        # Multiple of 8, capped at ~4 MiB, and sized so there are >= 2 grid
        # blocks (both v7x TensorCores get work). Last block may be partial:
        # Pallas clips the input DMA and masks the output writeback.
        tm = min(tm_cap, _round_up(_cdiv(rows, 2), 8))
    num_blocks = _cdiv(rows, tm)

    out2d = pl.pallas_call(
        _sq_scale_kernel,
        out_shape=jax.ShapeDtypeStruct((rows, lanes), x.dtype),
        grid=(num_blocks,),
        in_specs=[
            # alpha1 scalar lives in SMEM, whole (1,) array every step.
            pl.BlockSpec(memory_space=pltpu.MemorySpace.SMEM),
            # x: one (tm, lanes) tile per grid step -> auto double-buffered.
            pl.BlockSpec((tm, lanes), lambda i: (i, 0)),
        ],
        out_specs=pl.BlockSpec((tm, lanes), lambda i: (i, 0)),
        compiler_params=pltpu.CompilerParams(
            dimension_semantics=("parallel",),
            vmem_limit_bytes=_VMEM_LIMIT_BYTES,
        ),
    )(alpha1, x2d)

    return out2d.reshape(orig_shape)


if __name__ == "__main__":
    key = jax.random.PRNGKey(0)
    kx, ka, kx2 = jax.random.split(key, 3)

    # Small NCHW input consistent with the module's forward.
    x = jax.random.normal(kx, (2, 4, 16, 16), dtype=jnp.float32)
    # alpha1 ~ U(0, 1), shape (1,) as in the PyTorch parameter init.
    alpha1 = jax.random.uniform(ka, (1,), dtype=jnp.float32, minval=0.0, maxval=1.0)

    y = jax.block_until_ready(mylayer_forward(x, alpha1))
    y_ref = (x ** 2) * alpha1[0]
    assert y.shape == x.shape
    assert jnp.allclose(y, y_ref, atol=1e-6, rtol=1e-6), "mismatch vs reference"

    # Also exercise the partial-last-block path (rows=45, tm=24 -> masked
    # writeback of the final 21-row block).
    x2 = jax.random.normal(kx2, (3, 5, 24, 16), dtype=jnp.float32)
    y2 = jax.block_until_ready(mylayer_forward(x2, alpha1))
    y2_ref = (x2 ** 2) * alpha1[0]
    assert y2.shape == x2.shape
    assert jnp.allclose(y2, y2_ref, atol=1e-6, rtol=1e-6), "mismatch (partial block)"

    print("KERNEL_OK")
</pallas_src>

<mosaic_0001>
module attributes {stable_mosaic.version = 11 : i64} {
  func.func @_sq_scale_kernel(%arg0: i32, %arg1: memref<1xf32, #tpu.memory_space<smem>>, %arg2: memref<8x256xf32, #tpu.memory_space<vmem>>, %arg3: memref<8x256xf32, #tpu.memory_space<vmem>>) attributes {dimension_semantics = [#tpu.dimension_semantics<parallel>], iteration_bounds = array<i64: 1>, scalar_prefetch = 0 : i64, scratch_operands = 0 : i64, tpu.core_type = #tpu.core_type<tc>, window_params = [{transform_indices = @transform_0, window_bounds = array<i64: 1>}, {transform_indices = @transform_1, window_bounds = array<i64: 8, 256>}, {transform_indices = @transform_2, window_bounds = array<i64: 8, 256>}]} {
    %c0 = arith.constant 0 : index
    %0 = memref.load %arg1[%c0] : memref<1xf32, #tpu.memory_space<smem>>
    %c0_0 = arith.constant 0 : index
    %c0_1 = arith.constant 0 : index
    %1 = vector.load %arg2[%c0_0, %c0_1] : memref<8x256xf32, #tpu.memory_space<vmem>>, vector<8x256xf32>
    %2 = arith.mulf %1, %1 : vector<8x256xf32>
    %3 = vector.broadcast %0 : f32 to vector<8x256xf32>
    %4 = arith.mulf %2, %3 : vector<8x256xf32>
    %c0_2 = arith.constant 0 : index
    %c0_3 = arith.constant 0 : index
    %5 = vector.load %arg3[%c0_2, %c0_3] : memref<8x256xf32, #tpu.memory_space<vmem>>, vector<8x256xf32>
    tpu.vector_store %arg3[%c0_2, %c0_3], %4 {strides = array<i32>} : memref<8x256xf32, #tpu.memory_space<vmem>>, vector<8x256xf32>,
    return
  }
  func.func @transform_0(%arg0: i32) -> i32 {
    %c0_i32 = arith.constant 0 : i32
    %c0_i32_0 = arith.constant 0 : i32
    return %c0_i32 : i32
  }
  func.func @transform_1(%arg0: i32) -> (i32, i32) {
    %c0_i32 = arith.constant 0 : i32
    %c0_i32_0 = arith.constant 0 : i32
    return %arg0, %c0_i32 : i32, i32
  }
  func.func @transform_2(%arg0: i32) -> (i32, i32) {
    %c0_i32 = arith.constant 0 : i32
    %c0_i32_0 = arith.constant 0 : i32
    return %arg0, %c0_i32 : i32, i32
  }
}

</mosaic_0001>

<bundles_post_ra>
// kernel: tpu_custom_call.1
= control target key start
LH: loop header
LB: loop body
LE: loop exit
PB: predicated region body
PF: predicated region fallthrough
CT: control target
= control target key end

     0   :  { %8 = vsyncpa [#allocation4], 0  ;;  %s134_s0 = inlined_call_operand.<no memory space> [shape: f32[1], index: 0, kind: input, shape index: {}]   ;;  %s135_s1 = inlined_call_operand.hbm [shape: f32[8,256], index: 1, kind: input, shape index: {}]   ;;  %s136_s2 = inlined_call_operand.hbm [shape: f32[8,256], index: 2, kind: output, shape index: {}]  }
   0x1   :  { %9 = vsyncpa [#allocation5], 0  ;;  %s17_s11 = sshll.u32 %s135_s1, 4  ;;  %s108_s12 = smov [#allocation3]   ;;  %s18_s11 = int_to_ptr.hbm [resolvable:$true] %s17_s11 }
   0x2   :  { %s19_s13 = sshll.u32 %s108_s12, 4  ;;  %s20_s13 = int_to_ptr.vmem [resolvable:$true] %s19_s13 }
   0x3   :  { %22 = dma.hbm_to_vmem [thread:$0]  %s18_s11, 256, %s20_s13, [#allocation4]  }
   0x4   :  { %104 = dma.done.wait [#allocation4], 256  }
   0x5   :  { %105 = vsyncadd [#allocation4], 4294967040  ;;  %v28_v0 = vld [vmem:[#allocation3] sm:$0xff]  ;;  %v32_v1 = vstv %s134_s0  ;;  %v29_v2 = vld [vmem:[#allocation3 + $0x8] sm:$0xff]  ;;  %s109_s16 = smov [#allocation6]   ;;  %s44_s1 = sshll.u32 %s136_s2, 4  ;;  %s45_s1 = int_to_ptr.hbm [resolvable:$true] %s44_s1 }
   0x6   :  { %v30_v3 = vmul.f32 %v28_v0, %v28_v0  ;;  %v31_v4 = vmul.f32 %v29_v2, %v29_v2  ;;  %s42_s17 = sshll.u32 %s109_s16, 4  ;;  %s43_s17 = int_to_ptr.vmem [resolvable:$true] %s42_s17 }
   0x8   :  { %v33_v5 = vmul.f32 %v32_v1, %v30_v3  ;;  %v34_v6 = vmul.f32 %v32_v1, %v31_v4 }
   0xa   :  { %35 = vst [vmem:[#allocation6] sm:$0xff] %v33_v5 }
   0xb   :  { %36 = vst [vmem:[#allocation6 + $0x8] sm:$0xff] %v34_v6 }
   0xc   :  { %47 = dma.vmem_to_hbm [thread:$0]  %s43_s17, 256, %s45_s1, [#allocation5]  }
   0xd   :  { %106 = dma.done.wait [#allocation5], 256  }
   0xe   :  { %107 = vsyncadd [#allocation5], 4294967040 }
   0xf   :  { %52 = vsyncpa [#allocation4], 1 }
  0x10   :  { %53 = vsyncpa [#allocation5], 1 }

</bundles_post_ra>
